<compile_context>
chip_gen: v6e
topology: v6e:2x2x1
jax: 0.10.0
libtpu: 0.0.40
codegen_flags: <defaults>
</compile_context>

<pallas_src>
import math

import jax
import jax.numpy as jnp
from jax.experimental import pallas as pl
from jax.experimental.pallas import tpu as pltpu

NEG_SLOPE = 0.01
BN_EPS = 1e-5
LANE = 128
SUBLANE = 8


def _round_up(n, m):
    return ((n + m - 1) // m) * m


def _pad2(a, rows, cols):
    return jnp.pad(a, ((0, rows - a.shape[0]), (0, cols - a.shape[1])))


def _mlp_kernel(x_ref, w1_ref, w2_ref, b2_ref, w3_ref, b3_ref, o_ref):
    # Layer 1: Linear(F -> H1, bias=False) + LeakyReLU   (Dropout = identity)
    h = jnp.dot(x_ref[...], w1_ref[...], preferred_element_type=jnp.float32)
    h = jnp.where(h >= 0, h, NEG_SLOPE * h)
    # Layer 2: BN1 folded into Linear(H1 -> H2) + LeakyReLU
    h = jnp.dot(h.astype(w2_ref.dtype), w2_ref[...],
                preferred_element_type=jnp.float32) + b2_ref[...]
    h = jnp.where(h >= 0, h, NEG_SLOPE * h)
    # Layer 3: BN2 folded into Linear(H2 -> C, bias=True)
    out = jnp.dot(h.astype(w3_ref.dtype), w3_ref[...],
                  preferred_element_type=jnp.float32) + b3_ref[...]
    o_ref[...] = out.astype(o_ref.dtype)


def mlp_forward(x, kparams, *, block_b=512):
    """x: [B, F] float32. kparams: output of prepare_kernel_params()."""
    B, F = x.shape
    Fp = kparams["w1"].shape[0]
    Cp = kparams["b3"].shape[1]
    C = kparams["num_classes"]

    TB = min(block_b, _round_up(B, SUBLANE))   # batch tile (multiple of 8)
    Bp = _round_up(B, TB)

    xp = _pad2(x, Bp, Fp).astype(jnp.bfloat16)

    def resident(a):
        # Weights / biases: whole array, same block every grid step -> stays in VMEM.
        return pl.BlockSpec(a.shape, lambda i: (0, 0),
                            memory_space=pltpu.MemorySpace.VMEM)

    out = pl.pallas_call(
        _mlp_kernel,
        out_shape=jax.ShapeDtypeStruct((Bp, Cp), jnp.float32),
        grid=(Bp // TB,),
        in_specs=[
            pl.BlockSpec((TB, Fp), lambda i: (i, 0),
                         memory_space=pltpu.MemorySpace.VMEM),
            resident(kparams["w1"]),
            resident(kparams["w2"]),
            resident(kparams["b2"]),
            resident(kparams["w3"]),
            resident(kparams["b3"]),
        ],
        out_specs=pl.BlockSpec((TB, Cp), lambda i: (i, 0),
                               memory_space=pltpu.MemorySpace.VMEM),
        compiler_params=pltpu.CompilerParams(
            dimension_semantics=("parallel",)),
    )(xp, kparams["w1"], kparams["w2"], kparams["b2"],
      kparams["w3"], kparams["b3"])

    return out[:B, :C]


def init_params(key, num_features, num_classes, num_hidden_1, num_hidden_2):
    """Torch-like parameters (weights stored [in, out] so forward is x @ W)."""
    k1, k2, k3, k4 = jax.random.split(key, 4)

    def linear_w(k, fan_in, fan_out):
        bound = 1.0 / math.sqrt(fan_in)
        return jax.random.uniform(k, (fan_in, fan_out), jnp.float32, -bound, bound)

    w1 = linear_w(k1, num_features, num_hidden_1)
    w2 = linear_w(k2, num_hidden_1, num_hidden_2)
    w3 = linear_w(k3, num_hidden_2, num_classes)
    b3_bound = 1.0 / math.sqrt(num_hidden_2)
    b3 = jax.random.uniform(k4, (num_classes,), jnp.float32, -b3_bound, b3_bound)

    def bn_init(h):
        return dict(gamma=jnp.ones((h,), jnp.float32),
                    beta=jnp.zeros((h,), jnp.float32),
                    mean=jnp.zeros((h,), jnp.float32),
                    var=jnp.ones((h,), jnp.float32))

    return dict(w1=w1, w2=w2, w3=w3, b3=b3,
                bn1=bn_init(num_hidden_1), bn2=bn_init(num_hidden_2))


def prepare_kernel_params(p):
    """Fold eval-mode BN into the next Linear, pad lane dims to 128, cast to bf16."""
    w1, w2, w3, b3 = p["w1"], p["w2"], p["w3"], p["b3"]
    F, H1 = w1.shape
    H2, C = w3.shape

    def bn_fold(bn):
        scale = bn["gamma"] / jnp.sqrt(bn["var"] + BN_EPS)
        shift = bn["beta"] - bn["mean"] * scale
        return scale, shift

    s1, t1 = bn_fold(p["bn1"])
    s2, t2 = bn_fold(p["bn2"])

    # (h*s1 + t1) @ W2 == h @ (s1[:,None]*W2) + (t1 @ W2), likewise for W3/b3.
    w2f = s1[:, None] * w2
    b2f = t1 @ w2
    w3f = s2[:, None] * w3
    b3f = b3 + t2 @ w3

    Fp, H1p = _round_up(F, LANE), _round_up(H1, LANE)
    H2p, Cp = _round_up(H2, LANE), _round_up(C, LANE)

    return dict(
        w1=_pad2(w1, Fp, H1p).astype(jnp.bfloat16),
        w2=_pad2(w2f, H1p, H2p).astype(jnp.bfloat16),
        b2=_pad2(b2f[None, :], 1, H2p),              # f32
        w3=_pad2(w3f, H2p, Cp).astype(jnp.bfloat16),
        b3=_pad2(b3f[None, :], 1, Cp),               # f32
        num_classes=C,
    )


def reference_forward(x, p):
    """Pure-JAX f32 reference matching the torch module in eval mode."""
    def bn(h, bnp):
        scale = bnp["gamma"] / jnp.sqrt(bnp["var"] + BN_EPS)
        return (h - bnp["mean"]) * scale + bnp["beta"]

    h = x @ p["w1"]
    h = jnp.where(h >= 0, h, NEG_SLOPE * h)
    h = bn(h, p["bn1"])
    h = h @ p["w2"]
    h = jnp.where(h >= 0, h, NEG_SLOPE * h)
    h = bn(h, p["bn2"])
    return h @ p["w3"] + p["b3"]


def reference_forward_bf16(x, kp, B, C):
    """Same math/dtypes as the kernel (folded, padded, bf16) for a tight check."""
    Fp = kp["w1"].shape[0]
    xp = jnp.pad(x, ((0, 0), (0, Fp - x.shape[1]))).astype(jnp.bfloat16)
    h = jnp.dot(xp, kp["w1"], preferred_element_type=jnp.float32)
    h = jnp.where(h >= 0, h, NEG_SLOPE * h)
    h = jnp.dot(h.astype(jnp.bfloat16), kp["w2"],
                preferred_element_type=jnp.float32) + kp["b2"]
    h = jnp.where(h >= 0, h, NEG_SLOPE * h)
    out = jnp.dot(h.astype(jnp.bfloat16), kp["w3"],
                  preferred_element_type=jnp.float32) + kp["b3"]
    return out[:B, :C]


if __name__ == "__main__":
    # Small shapes consistent with the module:
    # num_features=64, hidden_1=128, hidden_2=64, num_classes=10, batch=8.
    B, F, H1, H2, C = 8, 64, 128, 64, 10

    key = jax.random.PRNGKey(0)
    kx, kp = jax.random.split(key)
    x = jax.random.normal(kx, (B, F), jnp.float32)

    params = init_params(kp, F, C, H1, H2)
    kparams = prepare_kernel_params(params)

    logits = mlp_forward(x, kparams)
    jax.block_until_ready(logits)
    assert logits.shape == (B, C)

    # Tight check vs. a JAX computation with identical (bf16/folded) numerics.
    ref_bf16 = reference_forward_bf16(x, kparams, B, C)
    assert jnp.allclose(logits, ref_bf16, atol=2e-3, rtol=2e-3), \
        float(jnp.max(jnp.abs(logits - ref_bf16)))

    # Loose check vs. the pure-f32 torch eval-mode semantics.
    ref_f32 = reference_forward(x, params)
    assert jnp.allclose(logits, ref_f32, atol=5e-2, rtol=5e-2), \
        float(jnp.max(jnp.abs(logits - ref_f32)))

    print("KERNEL_OK")
</pallas_src>

<mosaic_0001>
module attributes {stable_mosaic.version = 11 : i64} {
  func.func @_mlp_kernel(%arg0: i32, %arg1: memref<8x128xbf16, #tpu.memory_space<vmem>>, %arg2: memref<128x128xbf16, #tpu.memory_space<vmem>>, %arg3: memref<128x128xbf16, #tpu.memory_space<vmem>>, %arg4: memref<1x128xf32, #tpu.memory_space<vmem>>, %arg5: memref<128x128xbf16, #tpu.memory_space<vmem>>, %arg6: memref<1x128xf32, #tpu.memory_space<vmem>>, %arg7: memref<8x128xf32, #tpu.memory_space<vmem>>) attributes {dimension_semantics = [#tpu.dimension_semantics<parallel>], iteration_bounds = array<i64: 1>, scalar_prefetch = 0 : i64, scratch_operands = 0 : i64, tpu.core_type = #tpu.core_type<tc>, window_params = [{transform_indices = @transform_0, window_bounds = array<i64: 8, 128>}, {pipeline_mode = #tpu.pipeline_mode<synchronous>, transform_indices = @transform_1, window_bounds = array<i64: 128, 128>}, {pipeline_mode = #tpu.pipeline_mode<synchronous>, transform_indices = @transform_2, window_bounds = array<i64: 128, 128>}, {pipeline_mode = #tpu.pipeline_mode<synchronous>, transform_indices = @transform_3, window_bounds = array<i64: 1, 128>}, {pipeline_mode = #tpu.pipeline_mode<synchronous>, transform_indices = @transform_4, window_bounds = array<i64: 128, 128>}, {pipeline_mode = #tpu.pipeline_mode<synchronous>, transform_indices = @transform_5, window_bounds = array<i64: 1, 128>}, {transform_indices = @transform_6, window_bounds = array<i64: 8, 128>}]} {
    %c0 = arith.constant 0 : index
    %c0_0 = arith.constant 0 : index
    %0 = vector.load %arg1[%c0, %c0_0] : memref<8x128xbf16, #tpu.memory_space<vmem>>, vector<8x128xbf16>
    %c0_1 = arith.constant 0 : index
    %c0_2 = arith.constant 0 : index
    %1 = vector.load %arg2[%c0_1, %c0_2] : memref<128x128xbf16, #tpu.memory_space<vmem>>, vector<128x128xbf16>
    %cst = arith.constant dense<0.000000e+00> : vector<8x128xf32>
    %2 = tpu.matmul %0, %1, %cst {dimension_numbers = #tpu.dot_dimension_numbers<[1], [0], [0], [1], [0, 0, 1, 1], [], []>} : vector<8x128xbf16>, vector<128x128xbf16>, vector<8x128xf32> -> vector<8x128xf32>
    %cst_3 = arith.constant 0.000000e+00 : f32
    %3 = vector.broadcast %cst_3 : f32 to vector<8x128xf32>
    %4 = arith.cmpf oge, %2, %3 : vector<8x128xf32>
    %cst_4 = arith.constant 0.00999999977 : f32
    %5 = vector.broadcast %cst_4 : f32 to vector<8x128xf32>
    %6 = arith.mulf %5, %2 : vector<8x128xf32>
    %7 = arith.select %4, %2, %6 : vector<8x128xi1>, vector<8x128xf32>
    %8 = arith.truncf %7 : vector<8x128xf32> to vector<8x128xbf16>
    %c0_5 = arith.constant 0 : index
    %c0_6 = arith.constant 0 : index
    %9 = vector.load %arg3[%c0_5, %c0_6] : memref<128x128xbf16, #tpu.memory_space<vmem>>, vector<128x128xbf16>
    %cst_7 = arith.constant dense<0.000000e+00> : vector<8x128xf32>
    %10 = tpu.matmul %8, %9, %cst_7 {dimension_numbers = #tpu.dot_dimension_numbers<[1], [0], [0], [1], [0, 0, 1, 1], [], []>} : vector<8x128xbf16>, vector<128x128xbf16>, vector<8x128xf32> -> vector<8x128xf32>
    %c0_8 = arith.constant 0 : index
    %c0_9 = arith.constant 0 : index
    %11 = vector.load %arg4[%c0_8, %c0_9] : memref<1x128xf32, #tpu.memory_space<vmem>>, vector<1x128xf32>
    %12 = vector.broadcast %11 : vector<1x128xf32> to vector<8x128xf32>
    %13 = arith.addf %10, %12 : vector<8x128xf32>
    %cst_10 = arith.constant 0.000000e+00 : f32
    %14 = vector.broadcast %cst_10 : f32 to vector<8x128xf32>
    %15 = arith.cmpf oge, %13, %14 : vector<8x128xf32>
    %cst_11 = arith.constant 0.00999999977 : f32
    %16 = vector.broadcast %cst_11 : f32 to vector<8x128xf32>
    %17 = arith.mulf %16, %13 : vector<8x128xf32>
    %18 = arith.select %15, %13, %17 : vector<8x128xi1>, vector<8x128xf32>
    %19 = arith.truncf %18 : vector<8x128xf32> to vector<8x128xbf16>
    %c0_12 = arith.constant 0 : index
    %c0_13 = arith.constant 0 : index
    %20 = vector.load %arg5[%c0_12, %c0_13] : memref<128x128xbf16, #tpu.memory_space<vmem>>, vector<128x128xbf16>
    %cst_14 = arith.constant dense<0.000000e+00> : vector<8x128xf32>
    %21 = tpu.matmul %19, %20, %cst_14 {dimension_numbers = #tpu.dot_dimension_numbers<[1], [0], [0], [1], [0, 0, 1, 1], [], []>} : vector<8x128xbf16>, vector<128x128xbf16>, vector<8x128xf32> -> vector<8x128xf32>
    %c0_15 = arith.constant 0 : index
    %c0_16 = arith.constant 0 : index
    %22 = vector.load %arg6[%c0_15, %c0_16] : memref<1x128xf32, #tpu.memory_space<vmem>>, vector<1x128xf32>
    %23 = vector.broadcast %22 : vector<1x128xf32> to vector<8x128xf32>
    %24 = arith.addf %21, %23 : vector<8x128xf32>
    %c0_17 = arith.constant 0 : index
    %c0_18 = arith.constant 0 : index
    %25 = vector.load %arg7[%c0_17, %c0_18] : memref<8x128xf32, #tpu.memory_space<vmem>>, vector<8x128xf32>
    tpu.vector_store %arg7[%c0_17, %c0_18], %24 {strides = array<i32>} : memref<8x128xf32, #tpu.memory_space<vmem>>, vector<8x128xf32>,
    return
  }
  func.func @transform_0(%arg0: i32) -> (i32, i32) {
    %c0_i32 = arith.constant 0 : i32
    %c0_i32_0 = arith.constant 0 : i32
    return %arg0, %c0_i32 : i32, i32
  }
  func.func @transform_1(%arg0: i32) -> (i32, i32) {
    %c0_i32 = arith.constant 0 : i32
    %c0_i32_0 = arith.constant 0 : i32
    %c0_i32_1 = arith.constant 0 : i32
    return %c0_i32, %c0_i32_0 : i32, i32
  }
  func.func @transform_2(%arg0: i32) -> (i32, i32) {
    %c0_i32 = arith.constant 0 : i32
    %c0_i32_0 = arith.constant 0 : i32
    %c0_i32_1 = arith.constant 0 : i32
    return %c0_i32, %c0_i32_0 : i32, i32
  }
  func.func @transform_3(%arg0: i32) -> (i32, i32) {
    %c0_i32 = arith.constant 0 : i32
    %c0_i32_0 = arith.constant 0 : i32
    %c0_i32_1 = arith.constant 0 : i32
    return %c0_i32, %c0_i32_0 : i32, i32
  }
  func.func @transform_4(%arg0: i32) -> (i32, i32) {
    %c0_i32 = arith.constant 0 : i32
    %c0_i32_0 = arith.constant 0 : i32
    %c0_i32_1 = arith.constant 0 : i32
    return %c0_i32, %c0_i32_0 : i32, i32
  }
  func.func @transform_5(%arg0: i32) -> (i32, i32) {
    %c0_i32 = arith.constant 0 : i32
    %c0_i32_0 = arith.constant 0 : i32
    %c0_i32_1 = arith.constant 0 : i32
    return %c0_i32, %c0_i32_0 : i32, i32
  }
  func.func @transform_6(%arg0: i32) -> (i32, i32) {
    %c0_i32 = arith.constant 0 : i32
    %c0_i32_0 = arith.constant 0 : i32
    return %arg0, %c0_i32 : i32, i32
  }
}

</mosaic_0001>

<bundles_post_ra>
// kernel: tpu_custom_call.1
= control target key start
LH: loop header
LB: loop body
LE: loop exit
PB: predicated region body
PF: predicated region fallthrough
CT: control target
= control target key end

     0   :  { %11 = vsyncpa [#allocation3], 0  ;;  %s789_s0 = inlined_call_operand.hbm [shape: bf16[8,128], index: 0, kind: input, shape index: {}]   ;;  %s790_s1 = inlined_call_operand.hbm [shape: bf16[128,128], index: 1, kind: input, shape index: {}]   ;;  %s791_s2 = inlined_call_operand.hbm [shape: bf16[128,128], index: 2, kind: input, shape index: {}]   ;;  %s792_s3 = inlined_call_operand.vmem [shape: f32[1,128], index: 3, kind: input, shape index: {}]   ;;  %s793_s4 = inlined_call_operand.hbm [shape: bf16[128,128], index: 4, kind: input, shape index: {}]   ;;  %s794_s5 = inlined_call_operand.vmem [shape: f32[1,128], index: 5, kind: input, shape index: {}]   ;;  %s795_s6 = inlined_call_operand.hbm [shape: f32[8,128], index: 6, kind: output, shape index: {}]  }
   0x1   :  { %12 = vsyncpa [#allocation6], 0 }
   0x2   :  { %13 = vsyncpa [#allocation9], 0 }
   0x3   :  { %14 = vsyncpa [#allocation4], 0  ;;  %s685_s21 = smov [#allocation5]  }
   0x4   :  { %s30_s22 = sshll.u32 %s685_s21, 4  ;;  %s31_s22 = int_to_ptr.vmem [resolvable:$true] %s30_s22 }
   0x5   :  { %s585_s23 = scalar_lea.vmem %s31_s22, 1024  ;;  %p590_p1 = scmp.lt.s32.totalorder %s31_s22, %s31_s22 }
   0x6   :  { %p586_p0 = scmp.ne.s32.totalorder %s31_s22, %s585_s23  ;;  %p591_p2 = scmp.lt.s32.totalorder %s585_s23, %s585_s23 }
   0x8   :  { %p592_p3 = por %p591_p2, %p590_p1 }
   0xa   :  { %p593_p4 = pnand %p592_p3, %p586_p0 }
   0xc   :  { %596 = shalt.err (!%p593_p4)
}
   0xd   :  { %s686_s24 = smov 64   ;;  %s687_s25 = smov 4  }
   0xe   :  { %36 = dma.hbm_to_vmem [thread:$0]  %s790_s1, 1024, %s31_s22, [#allocation6], %s686_s24, %s686_s24, %s687_s25  }
   0xf   :  { %s688_s28 = smov [#allocation2]   ;;  %s689_s30 = smov [#allocation7]  }
  0x10   :  { %s21_s29 = sshll.u32 %s688_s28, 4  ;;  %s42_s7 = sshll.u32 %s689_s30, 4  ;;  %s22_s29 = int_to_ptr.vmem [resolvable:$true] %s21_s29  ;;  %s43_s7 = int_to_ptr.vmem [resolvable:$true] %s42_s7 }
  0x11   :  { %s605_s8 = scalar_lea.vmem %s22_s29, 64  ;;  %p610_p6 = scmp.lt.s32.totalorder %s22_s29, %s22_s29 }
  0x12   :  { %p606_p5 = scmp.ne.s32.totalorder %s22_s29, %s605_s8  ;;  %p611_p7 = scmp.lt.s32.totalorder %s605_s8, %s605_s8 }
  0x14   :  { %p612_p8 = por %p611_p7, %p610_p6 }
  0x16   :  { %p613_p9 = pnand %p612_p8, %p606_p5 }
  0x18   :  { %616 = shalt.err (!%p613_p9)
}
  0x19   :  { %24 = dma.hbm_to_vmem [thread:$0]  %s789_s0, 64, %s22_s29, [#allocation3]  }
  0x1a   :  { %s625_s11 = scalar_lea.vmem %s43_s7, 1024  ;;  %p630_p11 = scmp.lt.s32.totalorder %s43_s7, %s43_s7 }
  0x1b   :  { %p626_p10 = scmp.ne.s32.totalorder %s43_s7, %s625_s11  ;;  %p631_p12 = scmp.lt.s32.totalorder %s625_s11, %s625_s11 }
  0x1d   :  { %p632_p13 = por %p631_p12, %p630_p11 }
  0x1f   :  { %p633_p0 = pnand %p632_p13, %p626_p10 }
  0x21   :  { %636 = shalt.err (!%p633_p0)
}
  0x22   :  { %48 = dma.hbm_to_vmem [thread:$0]  %s791_s2, 1024, %s43_s7, [#allocation6], %s686_s24, %s686_s24, %s687_s25  }
  0x23   :  { %s690_s13 = smov [#allocation8]  }
  0x24   :  { %s56_s14 = sshll.u32 %s690_s13, 4  ;;  %s57_s14 = int_to_ptr.vmem [resolvable:$true] %s56_s14 }
  0x25   :  { %s645_s15 = scalar_lea.vmem %s57_s14, 1024  ;;  %p650_p2 = scmp.lt.s32.totalorder %s57_s14, %s57_s14 }
  0x26   :  { %p646_p1 = scmp.ne.s32.totalorder %s57_s14, %s645_s15  ;;  %p651_p3 = scmp.lt.s32.totalorder %s645_s15, %s645_s15 }
  0x28   :  { %p652_p4 = por %p651_p3, %p650_p2 }
  0x2a   :  { %p653_p5 = pnand %p652_p4, %p646_p1 }
  0x2c   :  { %656 = shalt.err (!%p653_p5)
}
  0x2d   :  { %62 = dma.hbm_to_vmem [thread:$0]  %s793_s4, 1024, %s57_s14, [#allocation9], %s686_s24, %s686_s24, %s687_s25  }
  0x2e   :  { %677 = dma.done.wait [#allocation3], 64  }
  0x2f   :  { %678 = vsyncadd [#allocation3], 4294967232 }
  0x30   :  { %679 = dma.done.wait [#allocation6], 2048  }
  0x31   :  { %680 = vsyncadd [#allocation6], 4294965248 }
  0x32   :  { %681 = dma.done.wait [#allocation9], 1024  }
  0x33   :  { %682 = vsyncadd [#allocation9], 4294966272  ;;  %v691_v0 = vmov 0.0   ;;  %vm692_vm0 = vmmov 0   ;;  %v553_v1 = vld [vmem:[#allocation5 + $0x38] sm:$0xff]   ;;  %v554_v2 = vld [vmem:[#allocation5 + $0x30] sm:$0xff]  }
  0x34   :  { %484 = vmatprep.subr.bf16.mxu0 %v691_v0  ;;  %500 = vmatprep.mubr.msk.bf16.mxu0 %vm692_vm0, %v691_v0  ;;  %v555_v3 = vld [vmem:[#allocation5 + $0x28] sm:$0xff]   ;;  %v561_v4 = vld [vmem:[#allocation7 + $0x38] sm:$0xff]   ;;  %v556_v5 = vld [vmem:[#allocation5 + $0x20] sm:$0xff]   ;;  %s693_s19 = smov [#allocation10]  }
  0x35   :  { %504 = vmatprep.subr.bf16.mxu1 %v691_v0  ;;  %520 = vmatprep.mubr.msk.bf16.mxu1 %vm692_vm0, %v691_v0  ;;  %v562_v6 = vld [vmem:[#allocation7 + $0x30] sm:$0xff]   ;;  %v557_v7 = vld [vmem:[#allocation5 + $0x18] sm:$0xff]   ;;  %v563_v8 = vld [vmem:[#allocation7 + $0x28] sm:$0xff]   ;;  %s420_s20 = sshll.u32 %s693_s19, 4  ;;  %s421_s20 = int_to_ptr.vmem [resolvable:$true] %s420_s20 }
  0x36   :  { %485 = vmatpush3.bf16.msra.mxu0 %v553_v1  ;;  %505 = vmatpush3.bf16.msra.mxu1 %v561_v4  ;;  %v558_v9 = vld [vmem:[#allocation5 + $0x10] sm:$0xff]   ;;  %v564_v10 = vld [vmem:[#allocation7 + $0x20] sm:$0xff]   ;;  %v559_v11 = vld [vmem:[#allocation5 + $0x8] sm:$0xff]   ;;  %p662_p7 = scmp.lt.s32.totalorder %s421_s20, %s421_s20 }
  0x37   :  { %486 = vmatprep.subr.bf16.mxu0 %v691_v0  ;;  %506 = vmatprep.subr.bf16.mxu1 %v691_v0  ;;  %v565_v12 = vld [vmem:[#allocation7 + $0x18] sm:$0xff]   ;;  %v560_v13 = vld [vmem:[#allocation5] sm:$0xff]   ;;  %v566_v14 = vld [vmem:[#allocation7 + $0x10] sm:$0xff]  }
  0x38   :  { %v78_v15 = vld [vmem:[#allocation2] sm:$0xf]  ;;  %v567_v16 = vld [vmem:[#allocation7 + $0x8] sm:$0xff]   ;;  %v568_v17 = vld [vmem:[#allocation7] sm:$0xff]  }
  0x39   :  { %v569_v18 = vld [vmem:[#allocation8 + $0x38] sm:$0xff]   ;;  %v570_v19 = vld [vmem:[#allocation8 + $0x30] sm:$0xff]   ;;  %v571_v20 = vld [vmem:[#allocation8 + $0x28] sm:$0xff]  }
  0x3a   :  { %487 = vmatpush3.bf16.msra.mxu0 %v554_v2  ;;  %507 = vmatpush3.bf16.msra.mxu1 %v562_v6  ;;  %v572_v21 = vld [vmem:[#allocation8 + $0x20] sm:$0xff]   ;;  %v573_v22 = vld [vmem:[#allocation8 + $0x18] sm:$0xff]   ;;  %v574_v23 = vld [vmem:[#allocation8 + $0x10] sm:$0xff]  }
  0x3b   :  { %488 = vmatprep.subr.bf16.mxu0 %v691_v0  ;;  %508 = vmatprep.subr.bf16.mxu1 %v691_v0  ;;  %v575_v31 = vld [vmem:[#allocation8 + $0x8] sm:$0xff]   ;;  %v576_v32 = vld [vmem:[#allocation8] sm:$0xff]   ;;  %v439_v33 = vld [vmem:[%s792_s3] ss:$0 sm:$0xff]  ;;  %s657_s3 = scalar_lea.vmem %s421_s20, 128 }
  0x3c   :  { %v448_v42 = vld [vmem:[%s794_s5] ss:$0 sm:$0xff]  ;;  %p658_p6 = scmp.ne.s32.totalorder %s421_s20, %s657_s3  ;;  %p663_p8 = scmp.lt.s32.totalorder %s657_s3, %s657_s3 }
  0x3e   :  { %489 = vmatpush3.bf16.msra.mxu0 %v555_v3  ;;  %509 = vmatpush3.bf16.msra.mxu1 %v563_v8  ;;  %p664_p9 = por %p663_p8, %p662_p7 }
  0x3f   :  { %490 = vmatprep.subr.bf16.mxu0 %v691_v0  ;;  %510 = vmatprep.subr.bf16.mxu1 %v691_v0 }
  0x40   :  { %p665_p10 = pnand %p664_p9, %p658_p6 }
  0x42   :  { %491 = vmatpush3.bf16.msra.mxu0 %v556_v5  ;;  %511 = vmatpush3.bf16.msra.mxu1 %v564_v10 }
  0x43   :  { %492 = vmatprep.subr.bf16.mxu0 %v691_v0  ;;  %512 = vmatprep.subr.bf16.mxu1 %v691_v0 }
  0x46   :  { %493 = vmatpush3.bf16.msra.mxu0 %v557_v7  ;;  %513 = vmatpush3.bf16.msra.mxu1 %v565_v12 }
  0x47   :  { %494 = vmatprep.subr.bf16.mxu0 %v691_v0  ;;  %514 = vmatprep.subr.bf16.mxu1 %v691_v0 }
  0x4a   :  { %495 = vmatpush3.bf16.msra.mxu0 %v558_v9  ;;  %515 = vmatpush3.bf16.msra.mxu1 %v566_v14 }
  0x4b   :  { %496 = vmatprep.subr.bf16.mxu0 %v691_v0  ;;  %516 = vmatprep.subr.bf16.mxu1 %v691_v0 }
  0x4e   :  { %497 = vmatpush3.bf16.msra.mxu0 %v559_v11  ;;  %517 = vmatpush3.bf16.msra.mxu1 %v567_v16 }
  0x4f   :  { %498 = vmatprep.subr.bf16.mxu0 %v691_v0  ;;  %518 = vmatprep.subr.bf16.mxu1 %v691_v0 }
  0x52   :  { %499 = vmatpush3.bf16.msra.mxu0 %v560_v13  ;;  %519 = vmatpush3.bf16.msra.mxu1 %v568_v17 }
  0x53   :  { %524 = vmatprep.subr.bf16.mxu0 %v691_v0 }
  0x55   :  { %501 = vmatmul.mubr.bf16.vlgmr.msra.gmra.mxu0 %v78_v15 }
  0x56   :  { %540 = vmatprep.mubr.msk.bf16.mxu0 %vm692_vm0, %v691_v0  ;;  %525 = vmatpush3.bf16.msra.mxu0 %v569_v18 }
  0x57   :  { %526 = vmatprep.subr.bf16.mxu0 %v691_v0 }
  0x5a   :  { %527 = vmatpush3.bf16.msra.mxu0 %v570_v19 }
  0x5b   :  { %528 = vmatprep.subr.bf16.mxu0 %v691_v0 }
  0x5e   :  { %529 = vmatpush3.bf16.msra.mxu0 %v571_v20 }
  0x5f   :  { %530 = vmatprep.subr.bf16.mxu0 %v691_v0 }
  0x62   :  { %531 = vmatpush3.bf16.msra.mxu0 %v572_v21 }
  0x63   :  { %532 = vmatprep.subr.bf16.mxu0 %v691_v0 }
  0x66   :  { %533 = vmatpush3.bf16.msra.mxu0 %v573_v22 }
  0x67   :  { %534 = vmatprep.subr.bf16.mxu0 %v691_v0 }
  0x6a   :  { %535 = vmatpush3.bf16.msra.mxu0 %v574_v23 }
  0x6b   :  { %536 = vmatprep.subr.bf16.mxu0 %v691_v0 }
  0x6e   :  { %537 = vmatpush3.bf16.msra.mxu0 %v575_v31 }
  0x6f   :  { %538 = vmatprep.subr.bf16.mxu0 %v691_v0 }
  0x72   :  { %539 = vmatpush3.bf16.msra.mxu0 %v576_v32 }
 0x115   :  { %v177_v24 = vpop.f32.mrf.mxu0 }
 0x116   :  { %vm183_vm1 = vcmp.ge.f32.partialorder %v177_v24, 0.0  ;;  %v184_v25 = vmul.f32 0.01, %v177_v24 }
 0x117   :  { %v502_v26 = vpop.f32.mrf.mxu0 }
 0x118   :  { %v185_v27 = vsel %vm183_vm1, %v177_v24, %v184_v25 }
 0x119   :  { %v186_v28 = vpack.c.bf16 %v185_v27, %v185_v27  ;;  %v180_v29 = vpop.f32.mrf.mxu0 }
 0x11b   :  { %v503_v30 = vpop.f32.mrf.mxu0  ;;  %521 = vmatmul.mubr.bf16.vlgmr.msra.gmra.mxu1 %v186_v28 }
 0x1db   :  { %v292_v34 = vpop.f32.mrf.mxu1 }
 0x1dc   :  { %v293_v35 = vadd.f32 %v439_v33, %v292_v34 }
 0x1dd   :  { %v522_v36 = vpop.f32.mrf.mxu1 }
 0x1de   :  { %vm298_vm2 = vcmp.ge.f32.partialorder %v293_v35, 0.0  ;;  %v299_v37 = vmul.f32 0.01, %v293_v35 }
 0x1df   :  { %v295_v38 = vpop.f32.mrf.mxu1 }
 0x1e0   :  { %v300_v39 = vsel %vm298_vm2, %v293_v35, %v299_v37 }
 0x1e1   :  { %v301_v40 = vpack.c.bf16 %v300_v39, %v300_v39  ;;  %v523_v41 = vpop.f32.mrf.mxu1 }
 0x1e3   :  { %541 = vmatmul.mubr.bf16.vlgmr.msra.gmra.mxu0 %v301_v40 }
 0x2a3   :  { %v407_v43 = vpop.f32.mrf.mxu0 }
 0x2a4   :  { %v408_v44 = vadd.f32 %v448_v42, %v407_v43 }
 0x2a5   :  { %v542_v45 = vpop.f32.mrf.mxu0 }
 0x2a6   :  { %413 = vst [vmem:[#allocation10] sm:$0xff] %v408_v44 }
 0x2a7   :  { %v410_v46 = vpop.f32.mrf.mxu0 }
 0x2a8   :  { %668 = shalt.err (!%p665_p10)
}
 0x2a9   :  { %423 = dma.vmem_to_hbm [thread:$0]  %s421_s20, 128, %s795_s6, [#allocation4]   ;;  %v543_v47 = vpop.f32.mrf.mxu0 }
 0x2aa   :  { %683 = dma.done.wait [#allocation4], 128  }
 0x2ab   :  { %684 = vsyncadd [#allocation4], 4294967168 }
 0x2ac   :  { %427 = vsyncpa [#allocation3], 1 }
 0x2ad   :  { %428 = vsyncpa [#allocation6], 1 }
 0x2ae   :  { %429 = vsyncpa [#allocation9], 1 }
 0x2af   :  { %430 = vsyncpa [#allocation4], 1 }

</bundles_post_ra>
